<compile_context>
chip_gen: v6e
topology: v6e:2x2x1
jax: 0.10.0
libtpu: 0.0.40
codegen_flags: <defaults>
</compile_context>

<pallas_src>
import jax
import jax.numpy as jnp
import numpy as np
from jax.experimental import pallas as pl
from jax.experimental.pallas import tpu as pltpu


def _model_kernel(w_ref, x_ref, o_ref):
    # w_ref: (O, C) raw Linear weight in SMEM (scalars)
    # x_ref: (C, B, S) channel-major input in VMEM
    # o_ref: (B, S) softmax output in VMEM
    O, C = w_ref.shape

    # v3[b, s] = sum_c (2 * sum_o W[o, c]) * x[c, b, s]
    # Unrolled 4-tap FMA chain; the per-channel effective weight is a pure
    # scalar (SMEM) computation broadcast onto the (B, S) vreg slab.
    v3 = None
    for c in range(C):
        w_c = w_ref[0, c]
        for o in range(1, O):
            w_c = w_c + w_ref[o, c]
        w_c = 2.0 * w_c
        tap = w_c * x_ref[c]                 # (B, S) contiguous slab
        v3 = tap if v3 is None else v3 + tap

    # Exact softmax over the last (sequence) axis.  bias is dropped exactly
    # (constant shift along the softmax axis).
    m = jnp.max(v3, axis=-1, keepdims=True)
    e = jnp.exp(v3 - m)
    denom = jnp.sum(e, axis=-1, keepdims=True)
    o_ref[...] = e / denom                   # exact divide (no approx recip)


@jax.jit
def model_forward(x1, weight, bias=None):
    # bias is intentionally unused: it shifts v3 by a constant along the
    # softmax axis, which softmax is invariant to (exact elimination).
    del bias
    x1 = x1.astype(jnp.float32)
    weight = weight.astype(jnp.float32)
    B, C, S = x1.shape

    # Channel-major layout: each kernel tap x_ref[c] is a contiguous (B, S)
    # slab with B on sublanes and S on lanes (pure layout plumbing, fused
    # into this jit).
    x_cm = jnp.transpose(x1, (1, 0, 2))      # (C, B, S)

    # Single grid step over the whole (tiny) tensor: no per-batch grid, no
    # repeated weight DMA, 2-D output written once.
    return pl.pallas_call(
        _model_kernel,
        out_shape=jax.ShapeDtypeStruct((B, S), jnp.float32),
        in_specs=[
            pl.BlockSpec(memory_space=pltpu.MemorySpace.SMEM),  # raw W (O, C)
            pl.BlockSpec(memory_space=pltpu.MemorySpace.VMEM),  # x, full block
        ],
        out_specs=pl.BlockSpec(memory_space=pltpu.MemorySpace.VMEM),
    )(weight, x_cm)


def model_forward_ref(x1, weight, bias):
    # Pure-JAX reference that mirrors the PyTorch forward literally.
    v1 = jnp.transpose(x1, (0, 2, 1))            # permute(0, 2, 1)
    v2 = v1 @ weight.T + bias                    # F.linear
    v2 = jnp.tile(v2, (1, 1, 2))                 # repeat(1, 1, 2)
    v3 = jnp.sum(v2, axis=-1)                    # sum(dim=-1)
    return jax.nn.softmax(v3, axis=-1)           # Softmax(-1)


if __name__ == "__main__":
    key = jax.random.PRNGKey(0)
    kx, kw, kb = jax.random.split(key, 3)

    B, C, S, O = 2, 4, 8, 2        # batch=2, in_features=4, seq=8, out_features=2
    x1 = jax.random.normal(kx, (B, C, S), dtype=jnp.float32)

    # Deterministic Linear(4, 2) parameters (PyTorch-style uniform bound).
    bound = 1.0 / np.sqrt(C)
    weight = jax.random.uniform(kw, (O, C), minval=-bound, maxval=bound,
                                dtype=jnp.float32)
    bias = jax.random.uniform(kb, (O,), minval=-bound, maxval=bound,
                              dtype=jnp.float32)

    out = jax.block_until_ready(model_forward(x1, weight, bias))
    ref = model_forward_ref(x1, weight, bias)
    assert out.shape == (B, S)
    np.testing.assert_allclose(np.asarray(out), np.asarray(ref),
                               rtol=1e-5, atol=1e-6)
    print("KERNEL_OK")
</pallas_src>

<mosaic_0001>
module attributes {stable_mosaic.version = 11 : i64} {
  func.func @_model_kernel(%arg0: memref<2x4xf32, #tpu.memory_space<smem>>, %arg1: memref<4x2x8xf32, #tpu.memory_space<vmem>>, %arg2: memref<2x8xf32, #tpu.memory_space<vmem>>) attributes {dimension_semantics = [], scalar_prefetch = 0 : i64, scratch_operands = 0 : i64, tpu.core_type = #tpu.core_type<tc>} {
    %c0 = arith.constant 0 : index
    %c0_0 = arith.constant 0 : index
    %0 = memref.load %arg0[%c0, %c0_0] : memref<2x4xf32, #tpu.memory_space<smem>>
    %c1 = arith.constant 1 : index
    %c0_1 = arith.constant 0 : index
    %1 = memref.load %arg0[%c1, %c0_1] : memref<2x4xf32, #tpu.memory_space<smem>>
    %2 = arith.addf %0, %1 : f32
    %cst = arith.constant 2.000000e+00 : f32
    %3 = arith.mulf %cst, %2 : f32
    %c0_2 = arith.constant 0 : index
    %c0_3 = arith.constant 0 : index
    %c0_4 = arith.constant 0 : index
    %4 = vector.load %arg1[%c0_2, %c0_3, %c0_4] : memref<4x2x8xf32, #tpu.memory_space<vmem>>, vector<1x2x8xf32>
    %5 = vector.shape_cast %4 : vector<1x2x8xf32> to vector<2x8xf32>
    %6 = vector.broadcast %3 : f32 to vector<2x8xf32>
    %7 = arith.mulf %6, %5 : vector<2x8xf32>
    %c0_5 = arith.constant 0 : index
    %c1_6 = arith.constant 1 : index
    %8 = memref.load %arg0[%c0_5, %c1_6] : memref<2x4xf32, #tpu.memory_space<smem>>
    %c1_7 = arith.constant 1 : index
    %c1_8 = arith.constant 1 : index
    %9 = memref.load %arg0[%c1_7, %c1_8] : memref<2x4xf32, #tpu.memory_space<smem>>
    %10 = arith.addf %8, %9 : f32
    %cst_9 = arith.constant 2.000000e+00 : f32
    %11 = arith.mulf %cst_9, %10 : f32
    %c1_10 = arith.constant 1 : index
    %c0_11 = arith.constant 0 : index
    %c0_12 = arith.constant 0 : index
    %12 = vector.load %arg1[%c1_10, %c0_11, %c0_12] : memref<4x2x8xf32, #tpu.memory_space<vmem>>, vector<1x2x8xf32>
    %13 = vector.shape_cast %12 : vector<1x2x8xf32> to vector<2x8xf32>
    %14 = vector.broadcast %11 : f32 to vector<2x8xf32>
    %15 = arith.mulf %14, %13 : vector<2x8xf32>
    %16 = arith.addf %7, %15 : vector<2x8xf32>
    %c0_13 = arith.constant 0 : index
    %c2 = arith.constant 2 : index
    %17 = memref.load %arg0[%c0_13, %c2] : memref<2x4xf32, #tpu.memory_space<smem>>
    %c1_14 = arith.constant 1 : index
    %c2_15 = arith.constant 2 : index
    %18 = memref.load %arg0[%c1_14, %c2_15] : memref<2x4xf32, #tpu.memory_space<smem>>
    %19 = arith.addf %17, %18 : f32
    %cst_16 = arith.constant 2.000000e+00 : f32
    %20 = arith.mulf %cst_16, %19 : f32
    %c2_17 = arith.constant 2 : index
    %c0_18 = arith.constant 0 : index
    %c0_19 = arith.constant 0 : index
    %21 = vector.load %arg1[%c2_17, %c0_18, %c0_19] : memref<4x2x8xf32, #tpu.memory_space<vmem>>, vector<1x2x8xf32>
    %22 = vector.shape_cast %21 : vector<1x2x8xf32> to vector<2x8xf32>
    %23 = vector.broadcast %20 : f32 to vector<2x8xf32>
    %24 = arith.mulf %23, %22 : vector<2x8xf32>
    %25 = arith.addf %16, %24 : vector<2x8xf32>
    %c0_20 = arith.constant 0 : index
    %c3 = arith.constant 3 : index
    %26 = memref.load %arg0[%c0_20, %c3] : memref<2x4xf32, #tpu.memory_space<smem>>
    %c1_21 = arith.constant 1 : index
    %c3_22 = arith.constant 3 : index
    %27 = memref.load %arg0[%c1_21, %c3_22] : memref<2x4xf32, #tpu.memory_space<smem>>
    %28 = arith.addf %26, %27 : f32
    %cst_23 = arith.constant 2.000000e+00 : f32
    %29 = arith.mulf %cst_23, %28 : f32
    %c3_24 = arith.constant 3 : index
    %c0_25 = arith.constant 0 : index
    %c0_26 = arith.constant 0 : index
    %30 = vector.load %arg1[%c3_24, %c0_25, %c0_26] : memref<4x2x8xf32, #tpu.memory_space<vmem>>, vector<1x2x8xf32>
    %31 = vector.shape_cast %30 : vector<1x2x8xf32> to vector<2x8xf32>
    %32 = vector.broadcast %29 : f32 to vector<2x8xf32>
    %33 = arith.mulf %32, %31 : vector<2x8xf32>
    %34 = arith.addf %25, %33 : vector<2x8xf32>
    %cst_27 = arith.constant dense<0xFF800000> : vector<2xf32>
    %35 = vector.multi_reduction <maximumf>, %34, %cst_27 [1] : vector<2x8xf32> to vector<2xf32>
    %36 = vector.shape_cast %35 : vector<2xf32> to vector<2x1xf32>
    %37 = vector.broadcast %36 : vector<2x1xf32> to vector<2x8xf32>
    %38 = arith.subf %34, %37 : vector<2x8xf32>
    %39 = math.exp %38 : vector<2x8xf32>
    %cst_28 = arith.constant dense<0.000000e+00> : vector<2xf32>
    %40 = vector.multi_reduction <add>, %39, %cst_28 [1] : vector<2x8xf32> to vector<2xf32>
    %41 = vector.shape_cast %40 : vector<2xf32> to vector<2x1xf32>
    %42 = vector.broadcast %41 : vector<2x1xf32> to vector<2x8xf32>
    %43 = arith.divf %39, %42 : vector<2x8xf32>
    %c0_29 = arith.constant 0 : index
    %c0_30 = arith.constant 0 : index
    %44 = vector.load %arg2[%c0_29, %c0_30] : memref<2x8xf32, #tpu.memory_space<vmem>>, vector<2x8xf32>
    tpu.vector_store %arg2[%c0_29, %c0_30], %43 {strides = array<i32>} : memref<2x8xf32, #tpu.memory_space<vmem>>, vector<2x8xf32>,
    return
  }
}

</mosaic_0001>

<bundles_post_ra>
// kernel: model_forward.1
= control target key start
LH: loop header
LB: loop body
LE: loop exit
PB: predicated region body
PF: predicated region fallthrough
CT: control target
= control target key end

     0   :  { %7 = vsyncpa [#allocation4], 0  ;;  %s177_s0 = inlined_call_operand.vmem [shape: f32[2,4], index: 0, kind: input, shape index: {}]   ;;  %s178_s1 = inlined_call_operand.vmem [shape: f32[4,2,8], index: 1, kind: input, shape index: {}]   ;;  %s179_s2 = inlined_call_operand.hbm [shape: f32[2,8], index: 2, kind: output, shape index: {}]  }
   0x1   :  { %8 = vsyncpa [#allocation3], 0  ;;  %s15_s11 = sshll.u32 %s177_s0, 4  ;;  %s16_s11 = int_to_ptr.vmem [resolvable:$true] %s15_s11 }
   0x2   :  { %s103_s12 = scalar_lea.vmem %s16_s11, 32  ;;  %p108_p1 = scmp.lt.s32.totalorder %s16_s11, %s16_s11 }
   0x3   :  { %p104_p0 = scmp.ne.s32.totalorder %s16_s11, %s103_s12  ;;  %p109_p2 = scmp.lt.s32.totalorder %s103_s12, %s103_s12 }
   0x5   :  { %p110_p3 = por %p109_p2, %p108_p1 }
   0x7   :  { %p111_p4 = pnand %p110_p3, %p104_p0 }
   0x9   :  { %114 = shalt.err (!%p111_p4)
}
   0xa   :  { %s139_s13 = smov [#allocation2]  }
   0xb   :  { %18 = dma.vmem_to_smem %s16_s11, 32, %s139_s13, [#allocation4]  }
   0xc   :  { %135 = dma.done.wait [#allocation4], 32  }
   0xd   :  { %136 = vsyncadd [#allocation4], 4294967264 }
   0xe   :  { %24 = sfence }
   0xf   :  { %s25_s14 = sld [smem:[#allocation2]]  ;;  %v29_v0 = vld [vmem:[%s178_s1] sm:$0x3]  ;;  %v90_v2 = vld [vmem:[%s178_s1 + $0x2] sm:$0x3]  ;;  %vm59_vm0 = vcmask 58368  }
  0x10   :  { %s87_s15 = sld [smem:[#allocation2 + $0x80]]  ;;  %v93_v5 = vld [vmem:[%s178_s1 + $0x4] sm:$0x3]  ;;  %v96_v10 = vld [vmem:[%s178_s1 + $0x6] sm:$0x3]  ;;  %s140_s9 = smov [#allocation5]  }
  0x11   :  { %s88_s16 = sld [smem:[#allocation2 + $0x1]]  ;;  %s78_s1 = sshll.u32 %s140_s9, 4  ;;  %s79_s1 = int_to_ptr.vmem [resolvable:$true] %s78_s1 }
  0x12   :  { %s89_s17 = sld [smem:[#allocation2 + $0x81]]  ;;  %s115_s10 = scalar_lea.vmem %s79_s1, 32 }
  0x13   :  { %s91_s18 = sld [smem:[#allocation2 + $0x2]]  ;;  %p116_p5 = scmp.ne.s32.totalorder %s79_s1, %s115_s10 }
  0x14   :  { %s92_s19 = sld [smem:[#allocation2 + $0x82]]  ;;  %p120_p6 = scmp.lt.s32.totalorder %s79_s1, %s79_s1 }
  0x15   :  { %s94_s0 = sld [smem:[#allocation2 + $0x3]]  ;;  %p121_p7 = scmp.lt.s32.totalorder %s115_s10, %s115_s10 }
  0x16   :  { %s27_s20 = sadd.f32 %s87_s15, %s25_s14 }
  0x17   :  { %s95_s21 = sld [smem:[#allocation2 + $0x83]]  ;;  %p122_p8 = por %p121_p7, %p120_p6 }
  0x18   :  { %s28_s22 = smul.f32 2.0, %s27_s20  ;;  %s34_s25 = sadd.f32 %s89_s17, %s88_s16 }
  0x19   :  { %p123_p9 = pnand %p122_p8, %p116_p5 }
  0x1a   :  { %v30_v1 = vstv %s28_s22  ;;  %s35_s26 = smul.f32 2.0, %s34_s25  ;;  %s43_s29 = sadd.f32 %s92_s19, %s91_s18 }
  0x1b   :  { %v31_v3 = vmul.f32 %v30_v1, %v29_v0 }
  0x1c   :  { %v38_v4 = vstv %s35_s26  ;;  %s44_s30 = smul.f32 2.0, %s43_s29 }
  0x1d   :  { %v39_v6 = vmul.f32 %v90_v2, %v38_v4  ;;  %s52_s5 = sadd.f32 %s95_s21, %s94_s0 }
  0x1e   :  { %v47_v7 = vstv %s44_s30 }
  0x1f   :  { %v40_v8 = vadd.f32 %v39_v6, %v31_v3  ;;  %v48_v9 = vmul.f32 %v93_v5, %v47_v7  ;;  %s53_s6 = smul.f32 2.0, %s52_s5 }
  0x21   :  { %v49_v11 = vadd.f32 %v48_v9, %v40_v8  ;;  %v56_v12 = vstv %s53_s6 }
  0x22   :  { %v57_v13 = vmul.f32 %v96_v10, %v56_v12 }
  0x24   :  { %v58_v14 = vadd.f32 %v57_v13, %v49_v11 }
  0x26   :  { %v60_v15 = vsel %vm59_vm0, %v58_v14, -inf }
  0x27   :  { %61 = vmax.xlane.f32.xlu0 %v60_v15 }
  0xb0   :  { %v62_v16 = vpop.xlane.xlu0 %61 }
  0xb1   :  { %v63_v17 = vsub.f32 %v58_v14, %v62_v16 }
  0xb3   :  { %v64_v18 = vmul.f32 1.442695, %v63_v17 }
  0xb5   :  { %99 = vpow2.f32 %v64_v18 }
  0xc2   :  { %v100_v19 = vpop.eup %99 }
  0xc3   :  { %v66_v20 = vsel %vm59_vm0, %v100_v19, 0.0 }
  0xc4   :  { %67 = vadd.xlane.f32.xlu0 %v66_v20 }
 0x14d   :  { %v68_v21 = vpop.xlane.xlu0 %67 }
 0x14e   :  { %101 = vrcp.f32 %v68_v21 }
 0x15b   :  { %v102_v22 = vpop.eup %101 }
 0x15c   :  { %v70_v23 = vmul.f32 %v102_v22, %v100_v19 }
 0x15e   :  { %71 = vst.msk [vmem:[#allocation5] sm:$0x3] %vm59_vm0, %v70_v23 }
 0x15f   :  { %126 = shalt.err (!%p123_p9)
}
 0x160   :  { %81 = dma.vmem_to_hbm [thread:$0]  %s79_s1, 32, %s179_s2, [#allocation3]  }
 0x161   :  { %137 = dma.done.wait [#allocation3], 32  }
 0x162   :  { %138 = vsyncadd [#allocation3], 4294967264 }
 0x163   :  { %85 = vsyncpa [#allocation3], 1 }
 0x164   :  { %86 = vsyncpa [#allocation4], 1 }

</bundles_post_ra>
